<compile_context>
chip_gen: v7x
topology: tpu7x:2x2x1
jax: 0.10.0
libtpu: 0.0.40
codegen_flags: <defaults>
</compile_context>

<pallas_src>
import functools

import jax
import jax.numpy as jnp
from jax import lax
from jax.experimental import pallas as pl
from jax.experimental.pallas import tpu as pltpu

LANES = 128
# (4096, 128) f32 = 2 MiB per input per pipeline buffer; 3 inputs x 2 buffers
# = 12 MiB VMEM.  Good compromise across v5e (~92-96% roofline here, per
# review), v6e (~93%) and v7x (~85%) without risking VMEM pressure.
MAX_TILE_ROWS = 4096
VMEM_LIMIT_BYTES = 48 * 1024 * 1024


def _wbce_kernel(z_ref, t_ref, w_ref, out_ref,
                 *, tile_rows, last_valid_rows, need_mask):
    """One grid block: partial sums of loss and w into an (8, 256) tile."""

    def compute_and_store(mask_rows):
        z = z_ref[...].astype(jnp.float32)
        t = t_ref[...].astype(jnp.float32)
        w = w_ref[...].astype(jnp.float32)

        # loss = w * (relu(z) - z*t + log1p(exp(-|z|)))   (w factored out:
        # fewer vmuls/elem; exp(-|z|) cannot overflow).
        elem = w * (jnp.maximum(z, 0.0) - z * t + jnp.log1p(jnp.exp(-jnp.abs(z))))

        if mask_rows is not None:
            # Last grid block extends past the (rows, 128) slab: zero the
            # out-of-range rows.  Mask BOTH elem and w — the Pallas-padded
            # region holds unspecified data and 0 * NaN = NaN, so masking only
            # w would be wrong.
            row_ids = lax.broadcasted_iota(jnp.int32, (tile_rows, LANES), 0)
            m = row_ids < mask_rows
            elem = jnp.where(m, elem, 0.0)
            w = jnp.where(m, w, 0.0)

        # Per-block (8, 128) partial sums, merged into one lane-dense (8, 256)
        # output tile: loss in lanes [0,128), w in lanes [128,256).
        out_ref[:, 0:LANES] = elem.reshape(tile_rows // 8, 8, LANES).sum(axis=0)
        out_ref[:, LANES:2 * LANES] = w.reshape(tile_rows // 8, 8, LANES).sum(axis=0)

    if need_mask:
        # Only the last grid block needs the boundary mask; gate it so every
        # other block runs the pure unmasked path (keeps VALU headroom free).
        is_last = pl.program_id(0) == pl.num_programs(0) - 1

        @pl.when(jnp.logical_not(is_last))
        def _():
            compute_and_store(None)

        @pl.when(is_last)
        def _():
            compute_and_store(last_valid_rows)
    else:
        compute_and_store(None)


@jax.jit
def weighted_bce_loss_2d(logits, labels, weights):
    """Pallas implementation of WeightedBCELoss2d.forward. Returns a scalar."""
    z = logits.reshape(-1)
    t = labels.reshape(-1)
    w = weights.reshape(-1)
    n = z.shape[0]

    # Lane-dense (rows, 128) view.  Free reshape when n % 128 == 0 and
    # n >= 1024 (typical NCHW maps); otherwise pad with zeros (w = 0 so padded
    # elements contribute nothing to either sum).
    rows = max(-(-n // LANES), 8)
    pad = rows * LANES - n
    if pad:
        # TODO(synk): ragged path only — replace these full-array pad copies
        # with a 1-D BlockSpec + element-granular in-kernel mask.
        z = jnp.pad(z, (0, pad))
        t = jnp.pad(t, (0, pad))
        w = jnp.pad(w, (0, pad))

    z2 = z.reshape(rows, LANES)
    t2 = t.reshape(rows, LANES)
    w2 = w.reshape(rows, LANES)

    # Block rows: multiple of 8, never larger than the array, capped at
    # MAX_TILE_ROWS.  rows >= 8 is guaranteed above.
    tile_rows = min(MAX_TILE_ROWS, (rows // 8) * 8)
    num_blocks = pl.cdiv(rows, tile_rows)
    need_mask = (rows % tile_rows) != 0
    # Static number of valid rows in the last block (only used when need_mask).
    last_valid_rows = rows - (num_blocks - 1) * tile_rows

    kernel = functools.partial(
        _wbce_kernel,
        tile_rows=tile_rows,
        last_valid_rows=last_valid_rows,
        need_mask=need_mask,
    )

    in_spec = pl.BlockSpec((tile_rows, LANES), lambda i: (i, 0))
    out_spec = pl.BlockSpec((8, 2 * LANES), lambda i: (i, 0))

    in_bytes = (z2.size * jnp.dtype(z2.dtype).itemsize
                + t2.size * jnp.dtype(t2.dtype).itemsize
                + w2.size * jnp.dtype(w2.dtype).itemsize)
    out_bytes = num_blocks * 8 * 2 * LANES * 4
    cost = pl.CostEstimate(
        flops=6 * rows * LANES,
        transcendentals=2 * rows * LANES,
        bytes_accessed=in_bytes + out_bytes,
    )

    partials = pl.pallas_call(
        kernel,
        out_shape=jax.ShapeDtypeStruct((num_blocks * 8, 2 * LANES), jnp.float32),
        grid_spec=pltpu.PrefetchScalarGridSpec(
            num_scalar_prefetch=0,
            grid=(num_blocks,),
            in_specs=[in_spec, in_spec, in_spec],
            out_specs=out_spec,
        ),
        compiler_params=pltpu.CompilerParams(
            # Independent blocks -> both TensorCores on multi-TC chips.
            dimension_semantics=("parallel",),
            vmem_limit_bytes=VMEM_LIMIT_BYTES,
        ),
        cost_estimate=cost,
    )(z2, t2, w2)

    loss_sum = jnp.sum(partials[:, :LANES])
    w_sum = jnp.sum(partials[:, LANES:])
    return loss_sum / w_sum


def _reference(logits, labels, weights):
    z = logits.reshape(-1).astype(jnp.float32)
    t = labels.reshape(-1).astype(jnp.float32)
    w = weights.reshape(-1).astype(jnp.float32)
    loss = (w * jnp.maximum(z, 0.0) - w * z * t
            + w * jnp.log1p(jnp.exp(-jnp.abs(z))))
    return jnp.sum(loss) / jnp.sum(w)


if __name__ == "__main__":
    key = jax.random.PRNGKey(0)

    # 1) NCHW batch=2, channels=4, spatial=16x16 -> lane-aligned zero-copy path.
    # 2) Ragged shape -> pad + last-block row-mask path.
    # 3) Moderate ragged shape -> multi-block grid + pl.when-gated mask path.
    for shape in [(2, 4, 16, 16), (2, 3, 15, 17), (1, 1, 360, 130)]:
        k1, k2, k3, key = jax.random.split(key, 4)
        logits = jax.random.normal(k1, shape, dtype=jnp.float32) * 2.0
        labels = (jax.random.uniform(k2, shape) > 0.5).astype(jnp.float32)
        weights = jax.random.uniform(k3, shape, dtype=jnp.float32) + 0.1

        out = weighted_bce_loss_2d(logits, labels, weights)
        jax.block_until_ready(out)

        ref = _reference(logits, labels, weights)
        assert jnp.allclose(out, ref, atol=1e-5, rtol=1e-5), (shape, out, ref)

    print("KERNEL_OK")
</pallas_src>

<mosaic_0001>
module attributes {stable_mosaic.version = 11 : i64} {
  func.func @_wbce_kernel(%arg0: i32, %arg1: memref<16x128xf32, #tpu.memory_space<vmem>>, %arg2: memref<16x128xf32, #tpu.memory_space<vmem>>, %arg3: memref<16x128xf32, #tpu.memory_space<vmem>>, %arg4: memref<8x256xf32, #tpu.memory_space<vmem>>) attributes {dimension_semantics = [#tpu.dimension_semantics<parallel>], iteration_bounds = array<i64: 1>, scalar_prefetch = 0 : i64, scratch_operands = 0 : i64, tpu.core_type = #tpu.core_type<tc>, window_params = [{transform_indices = @transform_0, window_bounds = array<i64: 16, 128>}, {transform_indices = @transform_1, window_bounds = array<i64: 16, 128>}, {transform_indices = @transform_2, window_bounds = array<i64: 16, 128>}, {transform_indices = @transform_3, window_bounds = array<i64: 8, 256>}]} {
    %c0 = arith.constant 0 : index
    %c0_0 = arith.constant 0 : index
    %0 = vector.load %arg1[%c0, %c0_0] : memref<16x128xf32, #tpu.memory_space<vmem>>, vector<16x128xf32>
    %c0_1 = arith.constant 0 : index
    %c0_2 = arith.constant 0 : index
    %1 = vector.load %arg2[%c0_1, %c0_2] : memref<16x128xf32, #tpu.memory_space<vmem>>, vector<16x128xf32>
    %c0_3 = arith.constant 0 : index
    %c0_4 = arith.constant 0 : index
    %2 = vector.load %arg3[%c0_3, %c0_4] : memref<16x128xf32, #tpu.memory_space<vmem>>, vector<16x128xf32>
    %cst = arith.constant 0.000000e+00 : f32
    %3 = vector.broadcast %cst : f32 to vector<16x128xf32>
    %4 = arith.maximumf %0, %3 : vector<16x128xf32>
    %5 = arith.mulf %0, %1 : vector<16x128xf32>
    %6 = arith.subf %4, %5 : vector<16x128xf32>
    %7 = math.absf %0 : vector<16x128xf32>
    %cst_5 = arith.constant 0.000000e+00 : f32
    %8 = vector.broadcast %cst_5 : f32 to vector<16x128xf32>
    %9 = arith.subf %8, %7 : vector<16x128xf32>
    %10 = math.exp %9 : vector<16x128xf32>
    %11 = math.log1p %10 : vector<16x128xf32>
    %12 = arith.addf %6, %11 : vector<16x128xf32>
    %13 = arith.mulf %2, %12 : vector<16x128xf32>
    %14 = vector.shape_cast %13 : vector<16x128xf32> to vector<2x8x128xf32>
    %cst_6 = arith.constant dense<0.000000e+00> : vector<8x128xf32>
    %15 = vector.multi_reduction <add>, %14, %cst_6 [0] : vector<2x8x128xf32> to vector<8x128xf32>
    %c0_7 = arith.constant 0 : index
    %c0_8 = arith.constant 0 : index
    %16 = vector.load %arg4[%c0_7, %c0_8] : memref<8x256xf32, #tpu.memory_space<vmem>>, vector<8x128xf32>
    tpu.vector_store %arg4[%c0_7, %c0_8], %15 {strides = array<i32>} : memref<8x256xf32, #tpu.memory_space<vmem>>, vector<8x128xf32>,
    %17 = vector.shape_cast %2 : vector<16x128xf32> to vector<2x8x128xf32>
    %cst_9 = arith.constant dense<0.000000e+00> : vector<8x128xf32>
    %18 = vector.multi_reduction <add>, %17, %cst_9 [0] : vector<2x8x128xf32> to vector<8x128xf32>
    %c0_10 = arith.constant 0 : index
    %c128 = arith.constant 128 : index
    %19 = vector.load %arg4[%c0_10, %c128] : memref<8x256xf32, #tpu.memory_space<vmem>>, vector<8x128xf32>
    tpu.vector_store %arg4[%c0_10, %c128], %18 {strides = array<i32>} : memref<8x256xf32, #tpu.memory_space<vmem>>, vector<8x128xf32>,
    return
  }
  func.func @transform_0(%arg0: i32) -> (i32, i32) {
    %c0_i32 = arith.constant 0 : i32
    %c0_i32_0 = arith.constant 0 : i32
    return %arg0, %c0_i32 : i32, i32
  }
  func.func @transform_1(%arg0: i32) -> (i32, i32) {
    %c0_i32 = arith.constant 0 : i32
    %c0_i32_0 = arith.constant 0 : i32
    return %arg0, %c0_i32 : i32, i32
  }
  func.func @transform_2(%arg0: i32) -> (i32, i32) {
    %c0_i32 = arith.constant 0 : i32
    %c0_i32_0 = arith.constant 0 : i32
    return %arg0, %c0_i32 : i32, i32
  }
  func.func @transform_3(%arg0: i32) -> (i32, i32) {
    %c0_i32 = arith.constant 0 : i32
    %c0_i32_0 = arith.constant 0 : i32
    return %arg0, %c0_i32 : i32, i32
  }
}

</mosaic_0001>

<bundles_post_ra>
// kernel: weighted_bce_loss_2d.1
= control target key start
LH: loop header
LB: loop body
LE: loop exit
PB: predicated region body
PF: predicated region fallthrough
CT: control target
= control target key end

     0   :  { %s116_s0 = inlined_call_operand.vmem [shape: f32[16,128], index: 0, kind: input, shape index: {}]   ;;  %s117_s2 = inlined_call_operand.vmem [shape: f32[16,128], index: 2, kind: input, shape index: {}]   ;;  %s118_s3 = inlined_call_operand.vmem [shape: f32[8,256], index: 3, kind: output, shape index: {}]   ;;  %s119_s1 = inlined_call_operand.vmem [shape: f32[16,128], index: 1, kind: input, shape index: {}]  }
   0x1   :  { %v14_v0 = vld [vmem:[%s116_s0] sm:$0xff]  ;;  %v15_v1 = vld [vmem:[%s116_s0 + $0x8] sm:$0xff] }
   0x2   :  { %v18_v2 = vld [vmem:[%s117_s2] sm:$0xff]  ;;  %v19_v3 = vld [vmem:[%s117_s2 + $0x8] sm:$0xff]  ;;  %v26_v4 = vand.u32 2147483647, %v14_v0  ;;  %v27_v5 = vand.u32 2147483647, %v15_v1 }
   0x3   :  { %v58_v6 = vadd.f32 %v19_v3, %v18_v2  ;;  %v16_v17 = vld [vmem:[%s119_s1] sm:$0xff]  ;;  %v17_v18 = vld [vmem:[%s119_s1 + $0x8] sm:$0xff]  ;;  %v20_v20 = vmax.f32 %v14_v0, 0.0  ;;  %v21_v24 = vmax.f32 %v15_v1, 0.0 }
   0x4   :  { %v28_v7 = vsub.f32 0.0, %v26_v4  ;;  %v29_v8 = vsub.f32 0.0, %v27_v5  ;;  %v22_v21 = vmul.f32 %v16_v17, %v14_v0  ;;  %v23_v25 = vmul.f32 %v17_v18, %v15_v1 }
   0x5   :  { %59 = vst [vmem:[%s118_s3 + $0x8] sm:$0xff] %v58_v6 }
   0x6   :  { %v30_v9 = vmul.f32 1.442695, %v28_v7  ;;  %v32_v10 = vmul.f32 1.442695, %v29_v8  ;;  %v24_v29 = vsub.f32 %v20_v20, %v22_v21  ;;  %v25_v32 = vsub.f32 %v21_v24, %v23_v25 }
   0x8   :  { %64 = vpow2.f32 %v30_v9 }
   0x9   :  { %66 = vpow2.f32 %v32_v10 }
  0x12   :  { %v65_v11 = vpop.eup %64 }
  0x13   :  { %v67_v12 = vpop.eup %66  ;;  %v34_v13 = vadd.f32 1.0, %v65_v11  ;;  %v37_v15 = vmul.f32 -0.5, %v65_v11  ;;  %v40_v22 = vand.u32 2147483647, %v65_v11 }
  0x14   :  { %v43_v14 = vadd.f32 1.0, %v67_v12  ;;  %v46_v16 = vmul.f32 -0.5, %v67_v12  ;;  %v49_v26 = vand.u32 2147483647, %v67_v12 }
  0x15   :  { %68 = vlog2.f32 %v34_v13  ;;  %v38_v19 = vadd.f32 1.0, %v37_v15  ;;  %vm41_vm0 = vcmp.lt.f32.partialorder %v40_v22, 0.0004427343 }
  0x16   :  { %70 = vlog2.f32 %v43_v14  ;;  %v47_v23 = vadd.f32 1.0, %v46_v16  ;;  %vm50_vm1 = vcmp.lt.f32.partialorder %v49_v26, 0.0004427343 }
  0x17   :  { %v39_v27 = vmul.f32 %v65_v11, %v38_v19 }
  0x18   :  { %v48_v30 = vmul.f32 %v67_v12, %v47_v23 }
  0x1f   :  { %v69_v28 = vpop.eup %68 }
  0x20   :  { %v71_v31 = vpop.eup %70  ;;  %v36_v33 = vmul.f32 0.6931472, %v69_v28 }
  0x21   :  { %v45_v34 = vmul.f32 0.6931472, %v71_v31 }
  0x22   :  { %v42_v35 = vsel %vm41_vm0, %v39_v27, %v36_v33 }
  0x23   :  { %v51_v36 = vsel %vm50_vm1, %v48_v30, %v45_v34  ;;  %v52_v37 = vadd.f32 %v42_v35, %v24_v29 }
  0x24   :  { %v53_v38 = vadd.f32 %v51_v36, %v25_v32 }
  0x25   :  { %v54_v39 = vmul.f32 %v52_v37, %v18_v2 }
  0x26   :  { %v55_v40 = vmul.f32 %v53_v38, %v19_v3 }
  0x28   :  { %v56_v41 = vadd.f32 %v55_v40, %v54_v39 }
  0x2a   :  { %57 = vst [vmem:[%s118_s3] sm:$0xff] %v56_v41 }

</bundles_post_ra>
